<compile_context>
chip_gen: v7x
topology: tpu7x:2x2x1
jax: 0.10.0
libtpu: 0.0.40
codegen_flags: <defaults>
</compile_context>

<pallas_src>
import jax
import jax.numpy as jnp
from jax.experimental import pallas as pl
from jax.experimental.pallas import tpu as pltpu


def damping_kernel(x_ref, w1_ref, w2_ref, w3_ref, bias_ref, out_ref):
    x = x_ref[...]                                    # (2, tb)  feature x batch
    bias = bias_ref[...]                              # (144, 1) packed biases
    b1 = bias[0:64]                                   # fused layer-1 bias
    b2 = bias[64:128]                                 # fused layer-2 bias
    b3 = bias[128:136]                                # fused layer-3 bias (padded)
    dm = bias[136:138]                                # damp_min

    x0 = x[0:1, :]                                    # (1, tb)
    x1 = x[1:2, :]                                    # (1, tb)

    # --- fused layer 1 (2 -> 64): K=2, VPU outer-product instead of a nearly
    # empty MXU push. ----------------------------------------------------------
    w1 = w1_ref[...]                                  # (64, 2)
    h1 = jnp.tanh(w1[:, 0:1] * x0 + w1[:, 1:2] * x1 + b1)        # (64, tb)

    # --- fused layer 2 (64 -> 64): block-diagonal [w_d2, 0; 0, w_o2] on MXU ---
    h2 = jnp.tanh(
        jnp.dot(w2_ref[...], h1, preferred_element_type=jnp.float32) + b2
    )                                                             # (64, tb)

    # --- fused layer 3 (64 -> 3, padded to 8 output rows) ---------------------
    h3 = jnp.dot(w3_ref[...], h2, preferred_element_type=jnp.float32) + b3
    d3 = h3[0:2, :]                                   # diagonal head    (2, tb)
    c = h3[2:3, :]                                    # off-diag head    (1, tb)

    # --- relu + damp_min scaling, then D = L (L^T x) per sample ---------------
    d3r = (jnp.maximum(d3, 0.0) + dm) * x             # (2, tb)
    a = d3r[0:1, :]                                   # L[0,0]
    b = d3r[1:2, :]                                   # L[1,1]
    # L = [[a, 0], [c, b]];  D = L L^T x
    s0 = a * x0 + c * x1                              # (L^T x)_0
    s1 = b * x1                                       # (L^T x)_1
    row0 = a * s0                                     # a^2 x0 + a c x1
    row1 = c * s0 + b * s1                            # a c x0 + (c^2 + b^2) x1
    out_ref[...] = jnp.concatenate([row0, row1], axis=0)         # full-block store


def make_params(key):
    ks = jax.random.split(key, 6)
    u = lambda k, shape: jax.random.uniform(k, shape, jnp.float32, -0.2, 0.2)
    params = {
        "w_d1": u(ks[0], (2, 32)),
        "w_d2": u(ks[1], (32, 32)),
        "w_d3": u(ks[2], (32, 2)),
        "w_o1": u(ks[3], (2, 32)),
        "w_o2": u(ks[4], (32, 32)),
        "w_o3": u(ks[5], (32, 1)),
        "b_d1": jnp.zeros((32,), jnp.float32),
        "b_d2": jnp.zeros((32,), jnp.float32),
        "b_d3": jnp.zeros((2,), jnp.float32),
        "b_o1": jnp.zeros((32,), jnp.float32),
        "b_o2": jnp.zeros((32,), jnp.float32),
        "b_o3": jnp.zeros((1,), jnp.float32),
        "damp_min": jnp.array([0.001, 0.001], jnp.float32),
    }
    return params


def fuse_params(p):
    """Fuse the diag/off-diag MLPs into one block-diagonal 64-wide MLP,
    pre-transposed for the (feature, batch) lane-dense layout."""
    f32 = jnp.float32
    z32 = jnp.zeros((32, 32), f32)

    w1 = jnp.concatenate([p["w_d1"], p["w_o1"]], axis=1)           # (2, 64)
    w2 = jnp.block([[p["w_d2"], z32], [z32, p["w_o2"]]])           # (64, 64)
    w3 = jnp.concatenate(
        [jnp.concatenate([p["w_d3"], jnp.zeros((32, 1), f32)], axis=1),
         jnp.concatenate([jnp.zeros((32, 2), f32), p["w_o3"]], axis=1)],
        axis=0)                                                    # (64, 3)

    w1t = w1.T                                                     # (64, 2)
    w2t = w2.T                                                     # (64, 64)
    w3t = jnp.concatenate([w3.T, jnp.zeros((5, 64), f32)], axis=0) # (8, 64) padded

    b1 = jnp.concatenate([p["b_d1"], p["b_o1"]])                   # (64,)
    b2 = jnp.concatenate([p["b_d2"], p["b_o2"]])                   # (64,)
    b3 = jnp.concatenate([p["b_d3"], p["b_o3"],
                          jnp.zeros((5,), f32)])                   # (8,)
    bias = jnp.concatenate(
        [b1, b2, b3, p["damp_min"], jnp.zeros((6,), f32)])         # (144,)
    bias = bias.reshape(144, 1)
    return w1t, w2t, w3t, bias


def damping_forward(x, p, *, tb=256):
    """x: (B, 2) float32 -> (B, 2) float32. Any B; padded to a lane-aligned
    batch tile internally."""
    B = x.shape[0]
    Bp = ((B + tb - 1) // tb) * tb                     # pad batch to tile multiple
    n_tiles = Bp // tb

    w1t, w2t, w3t, bias = fuse_params(p)
    xT = x.T                                           # (2, B), lane-dense batch
    if Bp != B:
        xT = jnp.pad(xT, ((0, 0), (0, Bp - B)))

    full = lambda a: pl.BlockSpec(a.shape, lambda i: (0, 0))
    outT = pl.pallas_call(
        damping_kernel,
        out_shape=jax.ShapeDtypeStruct((2, Bp), jnp.float32),
        grid=(n_tiles,),
        in_specs=[pl.BlockSpec((2, tb), lambda i: (0, i)),
                  full(w1t), full(w2t), full(w3t), full(bias)],
        out_specs=pl.BlockSpec((2, tb), lambda i: (0, i)),
        compiler_params=pltpu.CompilerParams(
            dimension_semantics=("parallel",)),
    )(xT, w1t, w2t, w3t, bias)
    return outT[:, :B].T                               # (B, 2)


def damping_reference(x, p):
    d1t = jnp.tanh(x @ p["w_d1"] + p["b_d1"])
    d2t = jnp.tanh(d1t @ p["w_d2"] + p["b_d2"])
    d3 = d2t @ p["w_d3"] + p["b_d3"]
    d3r = (jax.nn.relu(d3) + p["damp_min"]) * x
    o1t = jnp.tanh(x @ p["w_o1"] + p["b_o1"])
    o2t = jnp.tanh(o1t @ p["w_o2"] + p["b_o2"])
    o3 = o2t @ p["w_o3"] + p["b_o3"]
    a, b, c = d3r[:, 0], d3r[:, 1], o3[:, 0]
    x0, x1 = x[:, 0], x[:, 1]
    D0 = a * a * x0 + a * c * x1
    D1 = a * c * x0 + (c * c + b * b) * x1
    return jnp.stack([D0, D1], axis=1)


if __name__ == "__main__":
    key = jax.random.PRNGKey(0)
    k_param, k_x = jax.random.split(key)
    params = make_params(k_param)

    B = 512                               # small batch; 2 lane-aligned tiles of 256
    x = jax.random.normal(k_x, (B, 2), jnp.float32)

    out = damping_forward(x, params, tb=256)
    out = jax.block_until_ready(out)

    ref = damping_reference(x, params)
    assert out.shape == (B, 2) and out.dtype == jnp.float32
    assert jnp.allclose(out, ref, atol=1e-4, rtol=1e-4), "mismatch vs reference"

    print("KERNEL_OK")
</pallas_src>

<mosaic_0001>
module attributes {stable_mosaic.version = 11 : i64} {
  func.func @damping_kernel(%arg0: i32, %arg1: memref<2x256xf32, #tpu.memory_space<vmem>>, %arg2: memref<64x2xf32, #tpu.memory_space<vmem>>, %arg3: memref<64x64xf32, #tpu.memory_space<vmem>>, %arg4: memref<8x64xf32, #tpu.memory_space<vmem>>, %arg5: memref<144x1xf32, #tpu.memory_space<vmem>>, %arg6: memref<2x256xf32, #tpu.memory_space<vmem>>) attributes {dimension_semantics = [#tpu.dimension_semantics<parallel>], iteration_bounds = array<i64: 2>, scalar_prefetch = 0 : i64, scratch_operands = 0 : i64, tpu.core_type = #tpu.core_type<tc>, window_params = [{transform_indices = @transform_0, window_bounds = array<i64: 2, 256>}, {pipeline_mode = #tpu.pipeline_mode<synchronous>, transform_indices = @transform_1, window_bounds = array<i64: 64, 2>}, {pipeline_mode = #tpu.pipeline_mode<synchronous>, transform_indices = @transform_2, window_bounds = array<i64: 64, 64>}, {pipeline_mode = #tpu.pipeline_mode<synchronous>, transform_indices = @transform_3, window_bounds = array<i64: 8, 64>}, {pipeline_mode = #tpu.pipeline_mode<synchronous>, transform_indices = @transform_4, window_bounds = array<i64: 144, 1>}, {transform_indices = @transform_5, window_bounds = array<i64: 2, 256>}]} {
    %c0 = arith.constant 0 : index
    %c0_0 = arith.constant 0 : index
    %0 = vector.load %arg1[%c0, %c0_0] : memref<2x256xf32, #tpu.memory_space<vmem>>, vector<2x256xf32>
    %c0_1 = arith.constant 0 : index
    %c0_2 = arith.constant 0 : index
    %1 = vector.load %arg5[%c0_1, %c0_2] : memref<144x1xf32, #tpu.memory_space<vmem>>, vector<144x1xf32>
    %2 = vector.extract_strided_slice %1 {offsets = [0, 0], sizes = [64, 1], strides = [1, 1]} : vector<144x1xf32> to vector<64x1xf32>
    %3 = vector.extract_strided_slice %1 {offsets = [64, 0], sizes = [64, 1], strides = [1, 1]} : vector<144x1xf32> to vector<64x1xf32>
    %4 = vector.extract_strided_slice %1 {offsets = [128, 0], sizes = [8, 1], strides = [1, 1]} : vector<144x1xf32> to vector<8x1xf32>
    %5 = vector.extract_strided_slice %1 {offsets = [136, 0], sizes = [2, 1], strides = [1, 1]} : vector<144x1xf32> to vector<2x1xf32>
    %6 = vector.extract_strided_slice %0 {offsets = [0, 0], sizes = [1, 256], strides = [1, 1]} : vector<2x256xf32> to vector<1x256xf32>
    %7 = vector.extract_strided_slice %0 {offsets = [1, 0], sizes = [1, 256], strides = [1, 1]} : vector<2x256xf32> to vector<1x256xf32>
    %c0_3 = arith.constant 0 : index
    %c0_4 = arith.constant 0 : index
    %8 = vector.load %arg2[%c0_3, %c0_4] : memref<64x2xf32, #tpu.memory_space<vmem>>, vector<64x2xf32>
    %9 = vector.extract_strided_slice %8 {offsets = [0, 0], sizes = [64, 1], strides = [1, 1]} : vector<64x2xf32> to vector<64x1xf32>
    %10 = vector.broadcast %9 : vector<64x1xf32> to vector<64x256xf32>
    %11 = vector.broadcast %6 : vector<1x256xf32> to vector<64x256xf32>
    %12 = arith.mulf %10, %11 : vector<64x256xf32>
    %13 = vector.extract_strided_slice %8 {offsets = [0, 1], sizes = [64, 1], strides = [1, 1]} : vector<64x2xf32> to vector<64x1xf32>
    %14 = vector.broadcast %13 : vector<64x1xf32> to vector<64x256xf32>
    %15 = vector.broadcast %7 : vector<1x256xf32> to vector<64x256xf32>
    %16 = arith.mulf %14, %15 : vector<64x256xf32>
    %17 = arith.addf %12, %16 : vector<64x256xf32>
    %18 = vector.broadcast %2 : vector<64x1xf32> to vector<64x256xf32>
    %19 = arith.addf %17, %18 : vector<64x256xf32>
    %20 = math.tanh %19 : vector<64x256xf32>
    %c0_5 = arith.constant 0 : index
    %c0_6 = arith.constant 0 : index
    %21 = vector.load %arg3[%c0_5, %c0_6] : memref<64x64xf32, #tpu.memory_space<vmem>>, vector<64x64xf32>
    %cst = arith.constant dense<0.000000e+00> : vector<64x256xf32>
    %22 = tpu.matmul %21, %20, %cst {dimension_numbers = #tpu.dot_dimension_numbers<[1], [0], [0], [1], [0, 0, 1, 1], [], []>} : vector<64x64xf32>, vector<64x256xf32>, vector<64x256xf32> -> vector<64x256xf32>
    %23 = vector.broadcast %3 : vector<64x1xf32> to vector<64x256xf32>
    %24 = arith.addf %22, %23 : vector<64x256xf32>
    %25 = math.tanh %24 : vector<64x256xf32>
    %c0_7 = arith.constant 0 : index
    %c0_8 = arith.constant 0 : index
    %26 = vector.load %arg4[%c0_7, %c0_8] : memref<8x64xf32, #tpu.memory_space<vmem>>, vector<8x64xf32>
    %cst_9 = arith.constant dense<0.000000e+00> : vector<8x256xf32>
    %27 = tpu.matmul %26, %25, %cst_9 {dimension_numbers = #tpu.dot_dimension_numbers<[1], [0], [0], [1], [0, 0, 1, 1], [], []>} : vector<8x64xf32>, vector<64x256xf32>, vector<8x256xf32> -> vector<8x256xf32>
    %28 = vector.broadcast %4 : vector<8x1xf32> to vector<8x256xf32>
    %29 = arith.addf %27, %28 : vector<8x256xf32>
    %30 = vector.extract_strided_slice %29 {offsets = [0, 0], sizes = [2, 256], strides = [1, 1]} : vector<8x256xf32> to vector<2x256xf32>
    %31 = vector.extract_strided_slice %29 {offsets = [2, 0], sizes = [1, 256], strides = [1, 1]} : vector<8x256xf32> to vector<1x256xf32>
    %cst_10 = arith.constant 0.000000e+00 : f32
    %32 = vector.broadcast %cst_10 : f32 to vector<2x256xf32>
    %33 = arith.maximumf %30, %32 : vector<2x256xf32>
    %34 = vector.broadcast %5 : vector<2x1xf32> to vector<2x256xf32>
    %35 = arith.addf %33, %34 : vector<2x256xf32>
    %36 = arith.mulf %35, %0 : vector<2x256xf32>
    %37 = vector.extract_strided_slice %36 {offsets = [0, 0], sizes = [1, 256], strides = [1, 1]} : vector<2x256xf32> to vector<1x256xf32>
    %38 = vector.extract_strided_slice %36 {offsets = [1, 0], sizes = [1, 256], strides = [1, 1]} : vector<2x256xf32> to vector<1x256xf32>
    %39 = arith.mulf %37, %6 : vector<1x256xf32>
    %40 = arith.mulf %31, %7 : vector<1x256xf32>
    %41 = arith.addf %39, %40 : vector<1x256xf32>
    %42 = arith.mulf %38, %7 : vector<1x256xf32>
    %43 = arith.mulf %37, %41 : vector<1x256xf32>
    %44 = arith.mulf %31, %41 : vector<1x256xf32>
    %45 = arith.mulf %38, %42 : vector<1x256xf32>
    %46 = arith.addf %44, %45 : vector<1x256xf32>
    %47 = tpu.concatenate %43, %46 in 0 : vector<1x256xf32>, vector<1x256xf32> -> vector<2x256xf32>
    %c0_11 = arith.constant 0 : index
    %c0_12 = arith.constant 0 : index
    %48 = vector.load %arg6[%c0_11, %c0_12] : memref<2x256xf32, #tpu.memory_space<vmem>>, vector<2x256xf32>
    tpu.vector_store %arg6[%c0_11, %c0_12], %47 {strides = array<i32>} : memref<2x256xf32, #tpu.memory_space<vmem>>, vector<2x256xf32>,
    return
  }
  func.func @transform_0(%arg0: i32) -> (i32, i32) {
    %c0_i32 = arith.constant 0 : i32
    %c0_i32_0 = arith.constant 0 : i32
    return %c0_i32, %arg0 : i32, i32
  }
  func.func @transform_1(%arg0: i32) -> (i32, i32) {
    %c0_i32 = arith.constant 0 : i32
    %c0_i32_0 = arith.constant 0 : i32
    %c0_i32_1 = arith.constant 0 : i32
    return %c0_i32, %c0_i32_0 : i32, i32
  }
  func.func @transform_2(%arg0: i32) -> (i32, i32) {
    %c0_i32 = arith.constant 0 : i32
    %c0_i32_0 = arith.constant 0 : i32
    %c0_i32_1 = arith.constant 0 : i32
    return %c0_i32, %c0_i32_0 : i32, i32
  }
  func.func @transform_3(%arg0: i32) -> (i32, i32) {
    %c0_i32 = arith.constant 0 : i32
    %c0_i32_0 = arith.constant 0 : i32
    %c0_i32_1 = arith.constant 0 : i32
    return %c0_i32, %c0_i32_0 : i32, i32
  }
  func.func @transform_4(%arg0: i32) -> (i32, i32) {
    %c0_i32 = arith.constant 0 : i32
    %c0_i32_0 = arith.constant 0 : i32
    %c0_i32_1 = arith.constant 0 : i32
    return %c0_i32, %c0_i32_0 : i32, i32
  }
  func.func @transform_5(%arg0: i32) -> (i32, i32) {
    %c0_i32 = arith.constant 0 : i32
    %c0_i32_0 = arith.constant 0 : i32
    return %c0_i32, %arg0 : i32, i32
  }
}

</mosaic_0001>

<bundles_post_ra>
// kernel: tpu_custom_call.1
= control target key start
LH: loop header
LB: loop body
LE: loop exit
PB: predicated region body
PF: predicated region fallthrough
CT: control target
= control target key end

     0   :  { %10 = vsyncpa [#allocation3], 0  ;;  %s1487_s0 = inlined_call_operand.vmem [shape: f32[2,512], index: 0, kind: input, shape index: {}]   ;;  %s1488_s1 = inlined_call_operand.vmem [shape: f32[64,2], index: 1, kind: input, shape index: {}]   ;;  %s1489_s2 = inlined_call_operand.vmem [shape: f32[64,64], index: 2, kind: input, shape index: {}]   ;;  %s1490_s3 = inlined_call_operand.vmem [shape: f32[8,64], index: 3, kind: input, shape index: {}]   ;;  %s1491_s4 = inlined_call_operand.vmem [shape: f32[144,1], index: 4, kind: input, shape index: {}]   ;;  %s1492_s5 = inlined_call_operand.hbm [shape: f32[2,512], index: 5, kind: output, shape index: {}]  }
   0x1   :  { %12 = vsyncpa [#allocation3 + $0x1], 0  ;;  %s1185_s18 = smov 0   ;;  %s1187_s19 = smov 0  }
   0x2   :  { %s1189_s20 = smov 0   ;;  %s1191_s21 = smov 0  }
   0x3 LB: > { %s1206_s22 = sadd.s32 4294967295, %s1148_s21   ;;  %s914_s23 = sadd.s32 4294967294, %s1148_s21   ;;  %s1148_s21 = sphi %s1191_s21, %s1498_s21   ;;  %s1144_s20 = sphi %s1189_s20, %s1497_s20   ;;  %s1140_s19 = sphi %s1187_s19, %s1496_s19   ;;  %s1136_s18 = sphi %s1185_s18, %s1495_s18  }
   0x4   : > { %s1210_s24 = sadd.s32 1, %s1148_s21   ;;  %s135_s25 = sadd.s32 1, %s1144_s20 }
   0x5   : > { %s132_s26 = ssub.s32 %s1148_s21, %s1210_s24  ;;  %p145_p0 = scmp.ne.s32.totalorder %s1144_s20, %s1140_s19 }
   0x6   : > { %p133_p1 = scmp.eq.s32.totalorder %s132_s26, 0  ;;  %p146_p2 = scmp.eq.s32.totalorder %s1206_s22, 1 }
   0x7   : > { %p151_p3 = scmp.ne.s32.totalorder %s1140_s19, %s1136_s18  ;;  %p152_p4 = scmp.eq.s32.totalorder %s914_s23, 1 }
   0x8   : > { %s1221_s27 = scalar_select %p133_p1, %s1144_s20, %s135_s25  }
   0x9   : > { %p1223_p5 = por %p146_p2, %p145_p0  ;;  %p1227_p6 = por %p152_p4, %p151_p3 }
   0xa   : > { %p917_p7 = scmp.ge.s32.totalorder %s1148_s21, 1  ;;  %p191_p8 = scmp.lt.s32.totalorder %s1148_s21, 3 }
   0xc   : > { %p192_p9 = pnand %p917_p7, %p191_p8 }
   0xd   : > { %v247_v0 = vld [vmem:[%s1488_s1 + $0x10] sm:$0xff] (!%p192_p9)  ;;  %v245_v1 = vld [vmem:[%s1488_s1] sm:$0xff] (!%p192_p9)  ;;  %v1150_v2 = vmov (!%p192_p9), 1   ;;  %v246_v4 = vld [vmem:[%s1488_s1 + $0x8] sm:$0xff] (!%p192_p9)  ;;  %v1151_v7 = vmov (!%p192_p9), 0   ;;  %v1152_v28 = vmov (!%p192_p9), 0.0   ;;  %v294_v29 = vlaneseq (!%p192_p9) }
   0xe   : > { %195 = sbr.rel (%p192_p9) target bundleno = 736 (0x2e0), region = 40  ;;  %1014 = vset.pattern.permute.xlu0 (!%p192_p9), %v1150_v2  ;;  %1012 = vset.pattern.permute.xlu1 (!%p192_p9), %v1150_v2  ;;  %v249_v3 = vld [vmem:[%s1488_s1 + $0x20] sm:$0xff] (!%p192_p9)  ;;  %v251_v5 = vld [vmem:[%s1488_s1 + $0x30] sm:$0xff] (!%p192_p9)  ;;  %v248_v6 = vld [vmem:[%s1488_s1 + $0x18] sm:$0xff] (!%p192_p9)  ;;  %s919_s9 = sshll.u32 (!%p192_p9), %s1206_s22, 1  ;;  %vm530_vm0 = vcmask (!%p192_p9), 523264  }
   0xf   : > { %337 = vperm.xlu0 (!%p192_p9), %1014, %v247_v0   ;;  %329 = vperm.xlu1 (!%p192_p9), %1012, %v245_v1   ;;  %v227_v8 = vld [vmem:[%s1491_s4] sm:$0xff] (!%p192_p9)  ;;  %v228_v9 = vld [vmem:[%s1491_s4 + $0x8] sm:$0xff] (!%p192_p9)  ;;  %v230_v11 = vld [vmem:[%s1491_s4 + $0x18] sm:$0xff] (!%p192_p9)  ;;  %p220_p10 = scmp.lt.s32.totalorder (!%p192_p9), %s919_s9, 3  ;;  %v1314_v32 = vshrl.u32 (!%p192_p9), %v294_v29, 7  ;;  %s216_s16 = sand.u32 (!%p192_p9), 1, %s1140_s19  }
  0x10   : > { %v250_v10 = vld [vmem:[%s1488_s1 + $0x28] sm:$0xff] (!%p192_p9)  ;;  %v235_v13 = vld [vmem:[%s1491_s4 + $0x40] sm:$0xff] (!%p192_p9)  ;;  %v229_v14 = vld [vmem:[%s1491_s4 + $0x10] sm:$0xff] (!%p192_p9)  ;;  %619 = vmatprep.mubr.f32.mxu0 (!%p192_p9), %v1152_v28  ;;  %757 = vmatprep.mubr.f32.mxu1 (!%p192_p9), %v1152_v28  ;;  %s918_s17 = sshll.u32 (!%p192_p9), %s216_s16, 2  ;;  %vm825_vm1 = vcmask (!%p192_p9), 1040384   ;;  %s936_s23 = sshll.u32 (!%p192_p9), %s1206_s22, 6 }
  0x11   : > { %v232_v12 = vld [vmem:[%s1491_s4 + $0x28] sm:$0xff] (!%p192_p9)  ;;  %v237_v15 = vld [vmem:[%s1491_s4 + $0x50] sm:$0xff] (!%p192_p9)  ;;  %v239_v16 = vld [vmem:[%s1491_s4 + $0x60] sm:$0xff] (!%p192_p9)  ;;  %v362_v35 = vsub.s32 (!%p192_p9), 1, %v1314_v32  ;;  %v296_v36 = vsub.s32 (!%p192_p9), 0, %v1314_v32  ;;  %v366_v37 = vsub.s32 (!%p192_p9), 3, %v1314_v32  ;;  %s1445_s7 = scalar_lea.hbm (!%p192_p9), %s1492_s5, %s936_s23 }
  0x12   : > { %v252_v17 = vld [vmem:[%s1488_s1 + $0x38] sm:$0xff] (!%p192_p9)  ;;  %v241_v18 = vld [vmem:[%s1491_s4 + $0x70] sm:$0xff] (!%p192_p9)  ;;  %v243_v19 = vld [vmem:[%s1491_s4 + $0x80] sm:$0xff] (!%p192_p9)  ;;  %v300_v39 = vsub.s32 (!%p192_p9), 2, %v1314_v32  ;;  %s218_s25 = scalar_lea.vmem (!%p192_p9), [#allocation2], %s918_s17  ;;  %s841_s8 = scalar_lea.sflag (!%p192_p9), [#allocation3], %s216_s16 }
  0x13   : > { %345 = vperm.xlu0 (!%p192_p9), %1014, %v249_v3   ;;  %333 = vperm.xlu1 (!%p192_p9), %1012, %v246_v4   ;;  %v231_v20 = vld [vmem:[%s1491_s4 + $0x20] sm:$0xff] (!%p192_p9)  ;;  %v233_v21 = vld [vmem:[%s1491_s4 + $0x30] sm:$0xff] (!%p192_p9)  ;;  %v234_v22 = vld [vmem:[%s1491_s4 + $0x38] sm:$0xff] (!%p192_p9)  ;;  %s855_s26 = sshll.u32 (!%p192_p9), %s218_s25, 4  ;;  %s1154_s22 = smov (!%p192_p9), [#allocation2]   ;;  %s1447_s26 = int_to_ptr.vmem [resolvable:$true] %s855_s26 }
  0x14   : > { %v236_v23 = vld [vmem:[%s1491_s4 + $0x48] sm:$0xff] (!%p192_p9)  ;;  %v238_v24 = vld [vmem:[%s1491_s4 + $0x58] sm:$0xff] (!%p192_p9) }
  0x15   : > { %v240_v25 = vld [vmem:[%s1491_s4 + $0x68] sm:$0xff]  ;;  %v242_v26 = vld [vmem:[%s1491_s4 + $0x78] sm:$0xff]  ;;  %s1500_s9 = smov (!%p220_p10, %s919_s9), 3 }
  0x16   : > { %v244_v27 = vld [vmem:[%s1491_s4 + $0x88] sm:$0xff]  ;;  %s920_s10 = sshll.u32 %s1500_s9, 1  ;;  %s1086_s9 = scalar_lea.vmem %s1447_s26, 64 }
  0x17   : > { %353 = vperm.xlu0 %1014, %v251_v5   ;;  %1013 = vset.pattern.permute.xlu1 %v1151_v7  ;;  %s223_s13 = scalar_lea.vmem %s1487_s0, %s920_s10  ;;  %p1087_p11 = scmp.ne.s32.totalorder %s1447_s26, %s1086_s9 }
  0x18   : > { %270 = vperm.xlu1 %1013, %v248_v6   ;;  %v1324_v38 = vld [vmem:[%s223_s13] sm:$0xf]  ;;  %s1090_s10 = sshll.u32 %s1154_s22, 4  ;;  %s1091_s10 = int_to_ptr.vmem [resolvable:$false] %s1090_s10 }
  0x19   : > { %v1330_v42 = vrot.slane %v1324_v38, %v362_v35  ;;  %v1333_v43 = vrot.slane %v1324_v38, %v296_v36  ;;  %v1336_v44 = vrot.slane %v1324_v38, %v366_v37  ;;  %v1339_v45 = vrot.slane %v1324_v38, %v300_v39  ;;  %p1088_p12 = pnand %p1087_p11, %p1223_p5  ;;  %s1092_s11 = scalar_lea.vmem %s1091_s10, 128 }
  0x1a   : > { %p1093_p0 = scmp.lt.s32.totalorder %s1447_s26, %s1091_s10  ;;  %p1094_p1 = scmp.lt.s32.totalorder %s1092_s11, %s1086_s9 }
  0x1b   : > { %1019 = vset.pattern.permute.xlu0 %v1151_v7  ;;  %v1342_v47 = vrot.slane %v1330_v42, %v362_v35  ;;  %v1345_v48 = vrot.slane %v1333_v43, %v296_v36  ;;  %v1348_v50 = vrot.slane %v1336_v44, %v362_v35  ;;  %v1351_v51 = vrot.slane %v1339_v45, %v296_v36  ;;  %p1089_p13 = pneg %p1088_p12 }
  0x1c   : > { %255 = vperm.xlu0 %1019, %v245_v1   ;;  %1015 = vset.pattern.permute.xlu1 %v1150_v2  ;;  %p1095_p2 = por %p1094_p1, %p1093_p0 }
  0x1d   : > { %341 = vperm.xlu1 %1015, %v248_v6  }
  0x1e   : > { %p1096_p3 = pnand %p1095_p2, %p1089_p13 }
  0x20   : > { %260 = vperm.xlu0 %1019, %v246_v4  }
  0x21   : > { %1016 = vset.pattern.permute.xlu1 %v1151_v7 }
  0x22   : > { %412 = vperm.xlu1 %1016, %v227_v8  }
  0x24   : > { %265 = vperm.xlu0 %1019, %v247_v0  }
  0x26   : > { %275 = vperm.xlu1 %1016, %v249_v3  }
  0x28   : > { %417 = vperm.xlu0 %1019, %v228_v9  }
  0x2a   : > { %280 = vperm.xlu1 %1016, %v250_v10  }
  0x2c   : > { %427 = vperm.xlu0 %1019, %v230_v11  }
  0x2e   : > { %1017 = vset.pattern.permute.xlu1 %v1150_v2 }
  0x2f   : > { %349 = vperm.xlu1 %1017, %v250_v10  }
  0x30   : > { %437 = vperm.xlu0 %1019, %v232_v12  }
  0x33   : > { %1018 = vset.pattern.permute.xlu1 %v1151_v7 }
  0x34   : > { %492 = vperm.xlu0 %1019, %v235_v13   ;;  %422 = vperm.xlu1 %1018, %v229_v14  }
  0x38   : > { %502 = vperm.xlu0 %1019, %v237_v15   ;;  %285 = vperm.xlu1 %1018, %v251_v5  }
  0x3c   : > { %512 = vperm.xlu0 %1019, %v239_v16   ;;  %290 = vperm.xlu1 %1018, %v252_v17  }
  0x40   : > { %522 = vperm.xlu0 %1019, %v241_v18   ;;  %1020 = vset.pattern.permute.xlu1 %v1150_v2 }
  0x41   : > { %357 = vperm.xlu1 %1020, %v252_v17  }
  0x44   : > { %687 = vperm.xlu0 %1019, %v243_v19  }
  0x45   : > { %1021 = vset.pattern.permute.xlu1 %v1151_v7 }
  0x46   : > { %432 = vperm.xlu1 %1021, %v231_v20  }
  0x4a   : > { %442 = vperm.xlu1 %1021, %v233_v21  }
  0x4e   : > { %447 = vperm.xlu1 %1021, %v234_v22  }
  0x52   : > { %497 = vperm.xlu1 %1021, %v236_v23  }
  0x56   : > { %507 = vperm.xlu1 %1021, %v238_v24  }
  0x5a   : > { %517 = vperm.xlu1 %1021, %v240_v25  }
  0x5e   : > { %527 = vperm.xlu1 %1021, %v242_v26  }
  0x62   : > { %768 = vperm.xlu1 %1021, %v244_v27  }
  0x8e   : > { %v330_v30 = vpop.permute.xlu1 %329  ;;  %v338_v31 = vpop.permute.xlu0 %337 }
  0x8f   : > { %v378_v55 = vmul.f32 %v1342_v47, %v330_v30  ;;  %v379_v56 = vmul.f32 %v1348_v50, %v330_v30  ;;  %v382_v12 = vmul.f32 %v1342_v47, %v338_v31  ;;  %v383_v14 = vmul.f32 %v1348_v50, %v338_v31 }
  0x92   : > { %v334_v33 = vpop.permute.xlu1 %333  ;;  %v1319_v34 = vpop.permute.xlu0 %345 }
  0x93   : > { %v380_v63 = vmul.f32 %v1342_v47, %v334_v33  ;;  %v381_v0 = vmul.f32 %v1348_v50, %v334_v33 }
  0x96   : > { %v1327_v40 = vpop.permute.xlu0 %353 }
  0x97   : > { %v271_v41 = vpop.permute.xlu1 %270 }
  0x98   : > { %v318_v13 = vmul.f32 %v1345_v48, %v271_v41  ;;  %v319_v15 = vmul.f32 %v1351_v51, %v271_v41 }
  0x9b   : > { %v256_v46 = vpop.permute.xlu0 %255 }
  0x9c   : > { %v342_v49 = vpop.permute.xlu1 %341  ;;  %v312_v52 = vmul.f32 %v1345_v48, %v256_v46  ;;  %v313_v53 = vmul.f32 %v1351_v51, %v256_v46 }
  0x9d   : > { %v384_v10 = vmul.f32 %v1342_v47, %v342_v49  ;;  %v385_v11 = vmul.f32 %v1348_v50, %v342_v49 }
  0x9e   : > { %v394_v60 = vadd.f32 %v378_v55, %v312_v52  ;;  %v395_v61 = vadd.f32 %v379_v56, %v313_v53 }
  0x9f   : > { %v261_v54 = vpop.permute.xlu0 %260  ;;  %v400_v20 = vadd.f32 %v384_v10, %v318_v13  ;;  %v401_v21 = vadd.f32 %v385_v11, %v319_v15  ;;  %v390_v11 = vmul.f32 %v1342_v47, %v1327_v40  ;;  %v391_v13 = vmul.f32 %v1348_v50, %v1327_v40 }
  0xa0   : > { %v314_v58 = vmul.f32 %v1345_v48, %v261_v54  ;;  %v315_v59 = vmul.f32 %v1351_v51, %v261_v54 }
  0xa1   : > { %v413_v57 = vpop.permute.xlu1 %412 }
  0xa2   : > { %v450_v1 = vadd.f32 %v413_v57, %v394_v60  ;;  %v451_v2 = vadd.f32 %v413_v57, %v395_v61  ;;  %v396_v4 = vadd.f32 %v380_v63, %v314_v58  ;;  %v397_v5 = vadd.f32 %v381_v0, %v315_v59 }
  0xa3   : > { %v266_v62 = vpop.permute.xlu0 %265  ;;  %v386_v58 = vmul.f32 %v1342_v47, %v1319_v34  ;;  %v387_v59 = vmul.f32 %v1348_v50, %v1319_v34 }
  0xa4   : > { %1022 = vtanh.f32 %v450_v1  ;;  %v316_v16 = vmul.f32 %v1345_v48, %v266_v62  ;;  %v317_v17 = vmul.f32 %v1351_v51, %v266_v62 }
  0xa5   : > { %v276_v3 = vpop.permute.xlu1 %275  ;;  %1024 = vtanh.f32 %v451_v2 }
  0xa6   : > { %v398_v25 = vadd.f32 %v382_v12, %v316_v16  ;;  %v399_v26 = vadd.f32 %v383_v14, %v317_v17  ;;  %v320_v60 = vmul.f32 %v1345_v48, %v276_v3  ;;  %v321_v61 = vmul.f32 %v1351_v51, %v276_v3 }
  0xa7   : > { %v418_v6 = vpop.permute.xlu0 %417 }
  0xa8   : > { %v452_v7 = vadd.f32 %v418_v6, %v396_v4  ;;  %v453_v8 = vadd.f32 %v418_v6, %v397_v5 }
  0xa9   : > { %v281_v9 = vpop.permute.xlu1 %280 }
  0xaa   : > { %1026 = vtanh.f32 %v452_v7  ;;  %v322_v52 = vmul.f32 %v1345_v48, %v281_v9  ;;  %v323_v53 = vmul.f32 %v1351_v51, %v281_v9  ;;  %v403_v9 = vadd.f32 %v387_v59, %v321_v61 }
  0xab   : > { %1028 = vtanh.f32 %v453_v8  ;;  %v428_v18 = vpop.permute.xlu0 %427  ;;  %v402_v8 = vadd.f32 %v386_v58, %v320_v60 }
  0xac   : > { %v456_v22 = vadd.f32 %v428_v18, %v400_v20  ;;  %v457_v24 = vadd.f32 %v428_v18, %v401_v21 }
  0xae   : > { %v350_v19 = vpop.permute.xlu1 %349  ;;  %v1023_v23 = vpop.eup %1022  ;;  %1030 = vtanh.f32 %v456_v22 }
  0xaf   : > { %v1025_v27 = vpop.eup %1024  ;;  %1032 = vtanh.f32 %v457_v24  ;;  %v388_v41 = vmul.f32 %v1342_v47, %v350_v19  ;;  %v389_v46 = vmul.f32 %v1348_v50, %v350_v19  ;;  %v438_v0 = vpop.permute.xlu0 %437 }
  0xb1   : > { %v404_v54 = vadd.f32 %v388_v41, %v322_v52  ;;  %v405_v56 = vadd.f32 %v389_v46, %v323_v53  ;;  %v483_v41 = vld [vmem:[%s1489_s2 + $0x8] sm:$0xff]  ;;  %v484_v46 = vld [vmem:[%s1489_s2 + $0x10] sm:$0xff]  ;;  %v486_v52 = vld [vmem:[%s1489_s2 + $0x20] sm:$0xff] }
  0xb2   : > { %v487_v53 = vld [vmem:[%s1489_s2 + $0x28] sm:$0xff] }
  0xb3   : > { %v423_v29 = vpop.permute.xlu1 %422  ;;  %v460_v2 = vadd.f32 %v438_v0, %v404_v54  ;;  %v461_v5 = vadd.f32 %v438_v0, %v405_v56  ;;  %v488_v54 = vld [vmem:[%s1489_s2 + $0x30] sm:$0xff]  ;;  %v493_v56 = vpop.permute.xlu0 %492 }
  0xb4   : > { %v1027_v30 = vpop.eup %1026  ;;  %v454_v33 = vadd.f32 %v423_v29, %v398_v25  ;;  %v455_v31 = vadd.f32 %v423_v29, %v399_v26 }
  0xb5   : > { %v1029_v35 = vpop.eup %1028  ;;  %v939_v36 = vpack.c.bf16 %v1027_v30, %v1023_v23 }
  0xb6   : > { %v937_v37 = vpack.c.bf16 %v1029_v35, %v1025_v27  ;;  %1034 = vtanh.f32 %v454_v33 }
  0xb7   : > { %v286_v39 = vpop.permute.xlu1 %285  ;;  %1036 = vtanh.f32 %v455_v31 }
  0xb8   : > { %938 = vmatprep.subr.bf16.mxu0 %v937_v37  ;;  %v1031_v55 = vpop.eup %1030  ;;  %v324_v7 = vmul.f32 %v1345_v48, %v286_v39  ;;  %v325_v10 = vmul.f32 %v1351_v51, %v286_v39  ;;  %1038 = vtanh.f32 %v460_v2  ;;  %v482_v39 = vld [vmem:[%s1489_s2] sm:$0xff] }
  0xb9   : > { %940 = vmatpush1.bf16.msra.mxu0 %v939_v36  ;;  %v1033_v57 = vpop.eup %1032  ;;  %1040 = vtanh.f32 %v461_v5 }
  0xba   : > { %v406_v16 = vadd.f32 %v390_v11, %v324_v7  ;;  %v407_v18 = vadd.f32 %v391_v13, %v325_v10 }
  0xbb   : > { %v291_v49 = vpop.permute.xlu1 %290 }
  0xbc   : > { %v326_v19 = vmul.f32 %v1345_v48, %v291_v49  ;;  %v327_v20 = vmul.f32 %v1351_v51, %v291_v49  ;;  %v485_v49 = vld [vmem:[%s1489_s2 + $0x18] sm:$0xff] }
  0xc0   : > { %v358_v62 = vpop.permute.xlu1 %357  ;;  %v1035_v63 = vpop.eup %1034 }
  0xc1   : > { %v1037_v1 = vpop.eup %1036  ;;  %v943_v4 = vpack.c.bf16 %v1031_v55, %v1035_v63  ;;  %v392_v14 = vmul.f32 %v1342_v47, %v358_v62  ;;  %v393_v15 = vmul.f32 %v1348_v50, %v358_v62  ;;  %v489_v55 = vld [vmem:[%s1489_s2 + $0x38] sm:$0xff] }
  0xc2   : > { %v941_v6 = vpack.c.bf16 %v1033_v57, %v1037_v1  ;;  %v1039_v47 = vpop.eup %1038 }
  0xc3   : > { %v408_v23 = vadd.f32 %v392_v14, %v326_v19  ;;  %v409_v24 = vadd.f32 %v393_v15, %v327_v20  ;;  %v1041_v50 = vpop.eup %1040 }
  0xc4   : > { %942 = vmatprep.subr.bf16.mxu0 %v941_v6 }
  0xc5   : > { %v433_v34 = vpop.permute.xlu1 %432  ;;  %944 = vmatpush1.bf16.msra.mxu0 %v943_v4 }
  0xc6   : > { %v458_v3 = vadd.f32 %v433_v34, %v402_v8  ;;  %v459_v12 = vadd.f32 %v433_v34, %v403_v9 }
  0xc8   : > { %1042 = vtanh.f32 %v458_v3 }
  0xc9   : > { %1044 = vtanh.f32 %v459_v12  ;;  %v443_v17 = vpop.permute.xlu1 %442 }
  0xca   : > { %v462_v21 = vadd.f32 %v443_v17, %v406_v16  ;;  %v463_v22 = vadd.f32 %v443_v17, %v407_v18 }
  0xcc   : > { %1046 = vtanh.f32 %v462_v21 }
  0xcd   : > { %v448_v25 = vpop.permute.xlu1 %447  ;;  %1048 = vtanh.f32 %v463_v22 }
  0xce   : > { %v464_v40 = vadd.f32 %v448_v25, %v408_v23  ;;  %v465_v26 = vadd.f32 %v448_v25, %v409_v24 }
  0xd0   : > { %1050 = vtanh.f32 %v464_v40 }
  0xd1   : > { %1052 = vtanh.f32 %v465_v26  ;;  %v498_v61 = vpop.permute.xlu1 %497 }
  0xd2   : > { %v1043_v27 = vpop.eup %1042 }
  0xd3   : > { %v1045_v29 = vpop.eup %1044  ;;  %v947_v30 = vpack.c.bf16 %v1039_v47, %v1043_v27 }
  0xd4   : > { %v945_v33 = vpack.c.bf16 %v1041_v50, %v1045_v29 }
  0xd5   : > { %v508_v7 = vpop.permute.xlu1 %507 }
  0xd6   : > { %946 = vmatprep.subr.bf16.mxu0 %v945_v33  ;;  %v1047_v48 = vpop.eup %1046 }
  0xd7   : > { %948 = vmatpush1.bf16.msra.mxu0 %v947_v30  ;;  %v1049_v51 = vpop.eup %1048 }
  0xd9   : > { %v518_v21 = vpop.permute.xlu1 %517 }
  0xda   : > { %v1051_v31 = vpop.eup %1050 }
  0xdb   : > { %v1053_v35 = vpop.eup %1052  ;;  %v951_v36 = vpack.c.bf16 %v1051_v31, %v1047_v48 }
  0xdc   : > { %v949_v37 = vpack.c.bf16 %v1053_v35, %v1049_v51 }
  0xdd   : > { %v528_v35 = vpop.permute.xlu1 %527 }
  0xde   : > { %950 = vmatprep.subr.bf16.mxu0 %v949_v37 }
  0xdf   : > { %952 = vmatpush1.bf16.msra.mxu0 %v951_v36 }
  0xe2   : > { %921 = vmatmul.mubr.msk.f32.vlgmr.msra.gmra.mrb[0].mxu0 %vm530_vm0, %v482_v39 }
  0xe3   : > { %625 = vmatprep.mubr.f32.mxu0 %v1152_v28 }
  0xe6   : > { %922 = vmatmul.mubr.msk.f32.gmra.mrb[2].mxu0 %vm530_vm0, %v483_v41 }
  0xe7   : > { %631 = vmatprep.mubr.f32.mxu0 %v1152_v28 }
  0xea   : > { %923 = vmatmul.mubr.msk.f32.gmra.mrb[4].mxu0 %vm530_vm0, %v484_v46 }
  0xeb   : > { %637 = vmatprep.mubr.f32.mxu0 %v1152_v28 }
  0xee   : > { %924 = vmatmul.mubr.msk.f32.gmra.mrb[6].mxu0 %vm530_vm0, %v485_v49 }
  0xef   : > { %643 = vmatprep.mubr.f32.mxu0 %v1152_v28 }
  0xf2   : > { %925 = vmatmul.mubr.msk.f32.gmra.mrb[8].mxu0 %vm530_vm0, %v486_v52 }
  0xf3   : > { %649 = vmatprep.mubr.f32.mxu0 %v1152_v28 }
  0xf6   : > { %926 = vmatmul.mubr.msk.f32.gmra.mrb[10].mxu0 %vm530_vm0, %v487_v53 }
  0xf7   : > { %655 = vmatprep.mubr.f32.mxu0 %v1152_v28 }
  0xfa   : > { %927 = vmatmul.mubr.msk.f32.gmra.mrb[12].mxu0 %vm530_vm0, %v488_v54 }
  0xfb   : > { %661 = vmatprep.mubr.f32.mxu0 %v1152_v28  ;;  %v503_v28 = vpop.permute.xlu0 %502 }
  0xfe   : > { %928 = vmatmul.mubr.msk.f32.gmra.mrb[14].mxu0 %vm530_vm0, %v489_v55 }
  0xff   : > { %v513_v12 = vpop.permute.xlu0 %512 }
 0x103   : > { %v523_v47 = vpop.permute.xlu0 %522 }
 0x1b5   : > { %v621_v57 = vpop.f32.mrb[0].mxu0 }
 0x1b6   : > { %v622_v58 = vadd.f32 %v621_v57, %v493_v56  ;;  %v623_v59 = vpop.f32.mrb[1].mxu0 }
 0x1b7   : > { %v624_v60 = vadd.f32 %v623_v59, %v493_v56 }
 0x1b8   : > { %1054 = vtanh.f32 %v622_v58 }
 0x1b9   : > { %v627_v62 = vpop.f32.mrb[2].mxu0  ;;  %1056 = vtanh.f32 %v624_v60 }
 0x1ba   : > { %v628_v63 = vadd.f32 %v627_v62, %v498_v61  ;;  %v629_v0 = vpop.f32.mrb[3].mxu0  ;;  %v684_v62 = vld [vmem:[%s1490_s3] sm:$0xff] }
 0x1bb   : > { %v630_v1 = vadd.f32 %v629_v0, %v498_v61 }
 0x1bc   : > { %1058 = vtanh.f32 %v628_v63  ;;  %v1153_v63 = vmov 1983009808  }
 0x1bd   : > { %1060 = vtanh.f32 %v630_v1  ;;  %v633_v2 = vpop.f32.mrb[4].mxu0  ;;  %v774_v0 = vunpack.c.l.s4 %v1153_v63 }
 0x1be   : > { %v634_v4 = vadd.f32 %v633_v2, %v503_v28  ;;  %v635_v5 = vpop.f32.mrb[5].mxu0  ;;  %v688_v2 = vpop.permute.xlu0 %687 }
 0x1bf   : > { %v636_v6 = vadd.f32 %v635_v5, %v503_v28  ;;  %v775_v1 = vunpack.c.0.s8 %v774_v0 }
 0x1c0   : > { %1062 = vtanh.f32 %v634_v4 }
 0x1c1   : > { %v639_v8 = vpop.f32.mrb[6].mxu0  ;;  %1064 = vtanh.f32 %v636_v6  ;;  %v778_v28 = vsub.s32 %v775_v1, %v1314_v32 }
 0x1c2   : > { %v640_v9 = vadd.f32 %v639_v8, %v508_v7  ;;  %v641_v10 = vpop.f32.mrb[7].mxu0  ;;  %v1055_v11 = vpop.eup %1054 }
 0x1c3   : > { %v642_v34 = vadd.f32 %v641_v10, %v508_v7  ;;  %v1057_v3 = vpop.eup %1056  ;;  %v779_v5 = vrot.slane %v1324_v38, %v778_v28  ;;  %v769_v10 = vpop.permute.xlu1 %768 }
 0x1c4   : > { %1066 = vtanh.f32 %v640_v9 }
 0x1c5   : > { %1068 = vtanh.f32 %v642_v34  ;;  %v645_v13 = vpop.f32.mrb[8].mxu0 }
 0x1c6   : > { %v1059_v14 = vpop.eup %1058  ;;  %v646_v15 = vadd.f32 %v645_v13, %v513_v12  ;;  %v647_v16 = vpop.f32.mrb[9].mxu0 }
 0x1c7   : > { %v1061_v17 = vpop.eup %1060  ;;  %v648_v18 = vadd.f32 %v647_v16, %v513_v12  ;;  %v955_v19 = vpack.c.bf16 %v1059_v14, %v1055_v11  ;;  %v780_v11 = vcombine.high %v779_v5, %v779_v5 }
 0x1c8   : > { %v953_v20 = vpack.c.bf16 %v1061_v17, %v1057_v3  ;;  %1070 = vtanh.f32 %v646_v15 }
 0x1c9   : > { %v651_v22 = vpop.f32.mrb[10].mxu0  ;;  %1072 = vtanh.f32 %v648_v18 }
 0x1ca   : > { %v652_v23 = vadd.f32 %v651_v22, %v518_v21  ;;  %v653_v24 = vpop.f32.mrb[11].mxu0  ;;  %954 = vmatprep.subr.bf16.mxu1 %v953_v20  ;;  %v1063_v40 = vpop.eup %1062 }
 0x1cb   : > { %v654_v25 = vadd.f32 %v653_v24, %v518_v21  ;;  %956 = vmatpush1.bf16.msra.mxu1 %v955_v19  ;;  %v1065_v26 = vpop.eup %1064 }
 0x1cc   : > { %1074 = vtanh.f32 %v652_v23 }
 0x1cd   : > { %1076 = vtanh.f32 %v654_v25  ;;  %v657_v50 = vpop.f32.mrb[12].mxu0 }
 0x1ce   : > { %v1067_v27 = vpop.eup %1066  ;;  %v658_v29 = vadd.f32 %v657_v50, %v523_v47  ;;  %v659_v30 = vpop.f32.mrb[13].mxu0 }
 0x1cf   : > { %v1069_v33 = vpop.eup %1068  ;;  %v660_v48 = vadd.f32 %v659_v30, %v523_v47  ;;  %v959_v51 = vpack.c.bf16 %v1067_v27, %v1063_v40 }
 0x1d0   : > { %v957_v31 = vpack.c.bf16 %v1069_v33, %v1065_v26  ;;  %1078 = vtanh.f32 %v658_v29 }
 0x1d1   : > { %v663_v36 = vpop.f32.mrb[14].mxu0  ;;  %1080 = vtanh.f32 %v660_v48 }
 0x1d2   : > { %v664_v37 = vadd.f32 %v663_v36, %v528_v35  ;;  %v665_v39 = vpop.f32.mrb[15].mxu0  ;;  %958 = vmatprep.subr.bf16.mxu1 %v957_v31  ;;  %v1071_v46 = vpop.eup %1070 }
 0x1d3   : > { %v666_v41 = vadd.f32 %v665_v39, %v528_v35  ;;  %960 = vmatpush1.bf16.msra.mxu1 %v959_v51  ;;  %v1073_v49 = vpop.eup %1072 }
 0x1d4   : > { %1082 = vtanh.f32 %v664_v37 }
 0x1d5   : > { %1084 = vtanh.f32 %v666_v41 }
 0x1d6   : > { %v1075_v52 = vpop.eup %1074 }
 0x1d7   : > { %v1077_v53 = vpop.eup %1076  ;;  %v963_v54 = vpack.c.bf16 %v1075_v52, %v1071_v46 }
 0x1d8   : > { %v961_v55 = vpack.c.bf16 %v1077_v53, %v1073_v49 }
 0x1da   : > { %962 = vmatprep.subr.bf16.mxu1 %v961_v55  ;;  %v1079_v56 = vpop.eup %1078 }
 0x1db   : > { %964 = vmatpush1.bf16.msra.mxu1 %v963_v54  ;;  %v1081_v57 = vpop.eup %1080 }
 0x1de   : > { %v1083_v58 = vpop.eup %1082 }
 0x1df   : > { %v1085_v59 = vpop.eup %1084  ;;  %v967_v60 = vpack.c.bf16 %v1083_v58, %v1079_v56 }
 0x1e0   : > { %v965_v61 = vpack.c.bf16 %v1085_v59, %v1081_v57 }
 0x1e2   : > { %966 = vmatprep.subr.bf16.mxu1 %v965_v61 }
 0x1e3   : > { %968 = vmatpush1.bf16.msra.mxu1 %v967_v60 }
 0x1e6   : > { %929 = vmatmul.mubr.msk.f32.vlgmr.msra.gmra.mrb[0].mxu1 %vm530_vm0, %v684_v62 }
 0x2b9   : > { %v759_v4 = vpop.f32.mrb[0].mxu1 }
 0x2ba   : > { %v760_v6 = vadd.f32 %v759_v4, %v688_v2  ;;  %v761_v7 = vpop.f32.mrb[1].mxu1 }
 0x2bb   : > { %v762_v8 = vadd.f32 %v761_v7, %v688_v2 }
 0x2bc   : > { %v764_v9 = vmax.f32 %v760_v6, 0.0  ;;  %v787_v12 = vmul.f32 %v760_v6, %v1330_v42 }
 0x2bd   : > { %v765_v34 = vmax.f32 %v762_v8, 0.0  ;;  %v788_v14 = vmul.f32 %v762_v8, %v1336_v44 }
 0x2be   : > { %v771_v3 = vadd.f32 %v769_v10, %v764_v9  ;;  %v791_v17 = vrot.slane %v787_v12, 2 }
 0x2bf   : > { %v772_v13 = vadd.f32 %v769_v10, %v765_v34  ;;  %v792_v19 = vrot.slane %v788_v14, 2 }
 0x2c0   : > { %v783_v15 = vmul.f32 %v779_v5, %v771_v3 }
 0x2c1   : > { %v784_v32 = vmul.f32 %v780_v11, %v772_v13 }
 0x2c2   : > { %v785_v16 = vmul.f32 %v783_v15, %v1333_v43  ;;  %v797_v38 = vmul.f32 %v783_v15, %v1330_v42 }
 0x2c3   : > { %v786_v18 = vmul.f32 %v784_v32, %v1339_v45  ;;  %v798_v20 = vmul.f32 %v784_v32, %v1336_v44 }
 0x2c4   : > { %v795_v21 = vadd.f32 %v791_v17, %v785_v16  ;;  %v809_v22 = vmul.f32 %v797_v38, %v783_v15 }
 0x2c5   : > { %v796_v23 = vadd.f32 %v792_v19, %v786_v18  ;;  %v810_v24 = vmul.f32 %v798_v20, %v784_v32 }
 0x2c6   : > { %v803_v25 = vrot.slane %v795_v21, 6  ;;  %v813_v47 = vrot.slane %v809_v22, 7  ;;  %v799_v45 = vmul.f32 %v795_v21, %v783_v15 }
 0x2c7   : > { %v804_v40 = vrot.slane %v796_v23, 6  ;;  %v814_v50 = vrot.slane %v810_v24, 7  ;;  %v800_v44 = vmul.f32 %v796_v23, %v784_v32 }
 0x2c8   : > { %v807_v26 = vmul.f32 %v803_v25, %v760_v6 }
 0x2c9   : > { %v808_v43 = vmul.f32 %v804_v40, %v762_v8 }
 0x2ca   : > { %v817_v27 = vadd.f32 %v813_v47, %v807_v26 }
 0x2cb   : > { %v818_v42 = vadd.f32 %v814_v50, %v808_v43 }
 0x2cc   : > { %v821_v29 = vrot.slane %v817_v27, 1 }
 0x2cd   : > { %v822_v30 = vrot.slane %v818_v42, 1 }
 0x2ce   : > { %v826_v33 = vsel %vm825_vm1, %v799_v45, %v821_v29 }
 0x2cf   : > { %v827_v48 = vsel %vm825_vm1, %v800_v44, %v822_v30 }
 0x2d0   : > { %v830_v51 = vcombine.low %v826_v33, %v827_v48 }
 0x2d2   : > { %930 = vst.sshfl [vmem:[%s218_s25] sm:$0x33 pattern:$0x76325410] %v830_v51 }
 0x2d3   : > { %1099 = shalt.err (!%p1096_p3)
}
 0x2d4   : > { %s1100_s12 = scalar_lea.hbm %s1445_s7, 64  ;;  %s1104_s15 = scalar_lea.hbm %s1492_s5, 128 }
 0x2d5   : > { %p1101_p4 = scmp.ne.s32.totalorder %s1445_s7, %s1100_s12  ;;  %p1105_p9 = scmp.lt.u32.totalorder %s1445_s7, %s1492_s5 }
 0x2d6   : > { %p1106_p10 = scmp.lt.u32.totalorder %s1104_s15, %s1100_s12  ;;  %p1108_p12 = scmp.lt.u32.totalorder %s1100_s12, %s1445_s7 }
 0x2d7   : > { %p1102_p7 = pnand %p1101_p4, %p1223_p5 }
 0x2d8   : > { %p1107_p11 = por %p1106_p10, %p1105_p9 }
 0x2d9   : > { %p1103_p8 = pneg %p1102_p7 }
 0x2da   : > { %p1109_p13 = por %p1108_p12, %p1107_p11 }
 0x2dc   : > { %p1110_p0 = pnand %p1109_p13, %p1103_p8 }
 0x2de   : > { %1113 = shalt.err (!%p1110_p0)
}
 0x2df   : > { %969 = dma.vmem_to_hbm [thread:$0]  (%p1223_p5), %s1447_s26, 64, %s1445_s7, %s841_s8  }
 0x2e0 PF: > { %p975_p1 = scmp.ge.s32.totalorder %s1148_s21, 2  ;;  %s867_s23 = sand.u32 1, %s1136_s18  }
 0x2e1   : > { %s868_s25 = scalar_lea.sflag [#allocation3], %s867_s23 }
 0x2e2   : > { %p972_p2 = pnand %p975_p1, %p1227_p6 }
 0x2e4   : > { %1131 = dma.done.wait (!%p972_p2), %s868_s25, 64  }
 0x2e5   : > { %1133 = vsyncadd (!%p972_p2), %s868_s25, 4294967232  ;;  %p15_p3 = scmp.ge.s32.totalorder %s1210_s24, 4   ;;  %s1495_s18 = smov %s1140_s19 }
 0x2e6   : > { %s1496_s19 = smov %s1144_s20  ;;  %s1497_s20 = smov %s1221_s27 }
 0x2e7   : > { %s1498_s21 = smov %s1210_s24  ;;  %17 = sbr.rel (!%p15_p3) target bundleno = 3 (0x3), region = 75 }
 0x2ee   :  { %873 = vsyncpa [#allocation3], 1 }
 0x2ef   :  { %875 = vsyncpa [#allocation3 + $0x1], 1 }

</bundles_post_ra>
